<compile_context>
chip_gen: v5e
topology: v5e:2x2
jax: 0.10.0
libtpu: 0.0.40
codegen_flags: <defaults>
</compile_context>

<pallas_src>
import math
import functools

import jax
import jax.numpy as jnp
from jax.experimental import pallas as pl
from jax.experimental.pallas import tpu as pltpu


def _round_up(x, m):
    return ((x + m - 1) // m) * m


def _spec(block_shape, index_map, single_buffer):
    """BlockSpec; optionally single-buffered for grid-invariant operands."""
    if single_buffer:
        return pl.BlockSpec(block_shape, index_map, pipeline_mode=pl.Buffered(1))
    return pl.BlockSpec(block_shape, index_map)


# ---------------------------------------------------------------------------
# Kernel 1: K/V input projections (hoisted out of the attention kernel).
# One grid step = one batch element; plain fused matmul + bias.
# ---------------------------------------------------------------------------
def _kv_proj_kernel(k_ref, v_ref, wk, bk, wv, bv, ko_ref, vo_ref, *, compute_dtype):
    k_in = k_ref[0].astype(compute_dtype)                           # (Sk, E)
    v_in = v_ref[0].astype(compute_dtype)
    k_p = jnp.dot(k_in, wk[...], preferred_element_type=jnp.float32) + bk[0]
    v_p = jnp.dot(v_in, wv[...], preferred_element_type=jnp.float32) + bv[0]
    ko_ref[0] = k_p.astype(ko_ref.dtype)
    vo_ref[0] = v_p.astype(vo_ref.dtype)


# ---------------------------------------------------------------------------
# Kernel 2: attention. One grid step = (batch element, query tile); both grid
# axes are independent ("parallel") because K/V arrive already projected.
# ---------------------------------------------------------------------------
def _mha_attn_kernel(q_ref, k_ref, v_ref, wq, bq, wo, bo, out_ref, *rest,
                     num_heads, head_dim, need_weights, compute_dtype):
    attn_ref = rest[0] if need_weights else None

    Tq = q_ref.shape[1]
    Sk = k_ref.shape[1]
    H, Dh = num_heads, head_dim
    E = H * Dh

    # TODO(synk): key_padding_mask / attn_mask are not plumbed through
    # (only the None-mask path of nn.MultiheadAttention is implemented).
    # TODO(synk): for very long Sk the (H,Tq,Sk) f32 score intermediate should
    # be K-tiled with an online (flash-style) softmax, especially on v7x.

    # ---- Q projection for this query tile (1/sqrt(head_dim) is pre-folded
    # into wq/bq in the wrapper, so no extra scaling multiply here).
    q_in = q_ref[0].astype(compute_dtype)                           # (Tq, E)
    q_p = (jnp.dot(q_in, wq[...], preferred_element_type=jnp.float32)
           + bq[0]).astype(compute_dtype)

    k_p = k_ref[0]                                                  # (Sk, E)
    v_p = v_ref[0]

    # ---- Head split: one reshape + one transpose per tensor (no per-head
    # lane slices / stack).
    q3 = jnp.swapaxes(q_p.reshape(Tq, H, Dh), 0, 1)                 # (H, Tq, Dh)
    k3 = jnp.swapaxes(k_p.reshape(Sk, H, Dh), 0, 1)                 # (H, Sk, Dh)
    v3 = jnp.swapaxes(v_p.reshape(Sk, H, Dh), 0, 1)                 # (H, Sk, Dh)

    # ---- Scores: contract the last dims (no explicit k.T), all heads at once.
    s = jnp.einsum("hqd,hkd->hqk", q3, k3,
                   preferred_element_type=jnp.float32)              # (H, Tq, Sk)

    # ---- Softmax statistics in f32. Normalization is DEFERRED to the context
    # (H*Tq*Dh multiplies instead of H*Tq*Sk) using the EUP approx reciprocal.
    m = jnp.max(s, axis=-1, keepdims=True)
    p = jnp.exp(s - m)                                              # un-normalized
    denom = jnp.sum(p, axis=-1, keepdims=True)                      # (H, Tq, 1)

    ctx3 = jnp.einsum("hqk,hkd->hqd", p.astype(compute_dtype), v3,
                      preferred_element_type=jnp.float32)           # (H, Tq, Dh)
    ctx3 = ctx3 * pl.reciprocal(denom, approx=True)                 # deferred norm

    # ---- Repack heads along lanes (one transpose + reshape) and project out.
    ctx = jnp.swapaxes(ctx3, 0, 1).reshape(Tq, E)                   # (Tq, E)
    out = jnp.dot(ctx.astype(compute_dtype), wo[...],
                  preferred_element_type=jnp.float32) + bo[0]
    out_ref[0] = out.astype(out_ref.dtype)

    if need_weights:
        # Exact normalization (rows sum to 1) only for the *returned* weights;
        # average_attn_weights=True -> mean over heads.
        p_norm = p * (1.0 / denom)
        attn_ref[0] = (jnp.sum(p_norm, axis=0) * (1.0 / H)).astype(attn_ref.dtype)


# ---------------------------------------------------------------------------
# pallas_call wrappers
# ---------------------------------------------------------------------------
def _project_kv(key, value, wk_t, bk, wv_t, bv, *, compute_dtype, single_buffer,
                vmem_limit):
    B, Sk, E = key.shape
    kernel = functools.partial(_kv_proj_kernel, compute_dtype=compute_dtype)

    kv_in_spec = pl.BlockSpec((1, Sk, E), lambda b: (b, 0, 0))
    w_spec = _spec((E, E), lambda b: (0, 0), single_buffer)
    b_spec = _spec((1, E), lambda b: (0, 0), single_buffer)
    out_spec = pl.BlockSpec((1, Sk, E), lambda b: (b, 0, 0))

    return pl.pallas_call(
        kernel,
        out_shape=(jax.ShapeDtypeStruct((B, Sk, E), compute_dtype),
                   jax.ShapeDtypeStruct((B, Sk, E), compute_dtype)),
        grid=(B,),
        in_specs=[kv_in_spec, kv_in_spec, w_spec, b_spec, w_spec, b_spec],
        out_specs=(out_spec, out_spec),
        compiler_params=pltpu.CompilerParams(
            dimension_semantics=("parallel",),
            vmem_limit_bytes=vmem_limit),
    )(key, value, wk_t, bk, wv_t, bv)


def _attention_call(query_padded, k_proj, v_proj, wq_t, bq, wo_t, bo, *,
                    num_heads, head_dim, need_weights, compute_dtype, out_dtype,
                    q_block, single_buffer, vmem_limit):
    B, Sq_pad, E = query_padded.shape
    Sk = k_proj.shape[1]
    num_q_blocks = Sq_pad // q_block

    kernel = functools.partial(_mha_attn_kernel, num_heads=num_heads,
                               head_dim=head_dim, need_weights=need_weights,
                               compute_dtype=compute_dtype)

    q_spec = pl.BlockSpec((1, q_block, E), lambda b, qi: (b, qi, 0))
    # Projected K/V, weights and biases are invariant across the qi axis
    # (K/V also across qi within one batch element) -> single-buffer them.
    kv_spec = _spec((1, Sk, E), lambda b, qi: (b, 0, 0), single_buffer)
    w_spec = _spec((E, E), lambda b, qi: (0, 0), single_buffer)
    b_spec = _spec((1, E), lambda b, qi: (0, 0), single_buffer)

    out_shape = [jax.ShapeDtypeStruct((B, Sq_pad, E), out_dtype)]
    out_specs = [pl.BlockSpec((1, q_block, E), lambda b, qi: (b, qi, 0))]
    if need_weights:
        out_shape.append(jax.ShapeDtypeStruct((B, Sq_pad, Sk), out_dtype))
        out_specs.append(pl.BlockSpec((1, q_block, Sk), lambda b, qi: (b, qi, 0)))

    return pl.pallas_call(
        kernel,
        out_shape=tuple(out_shape),
        grid=(B, num_q_blocks),
        in_specs=[q_spec, kv_spec, kv_spec, w_spec, b_spec, w_spec, b_spec],
        out_specs=tuple(out_specs),
        compiler_params=pltpu.CompilerParams(
            dimension_semantics=("parallel", "parallel"),
            vmem_limit_bytes=vmem_limit),
    )(query_padded, k_proj, v_proj, wq_t, bq, wo_t, bo)


def multi_head_attention_cp(query, key, value, params, *, num_heads, head_dim,
                            batch_first=True, need_weights=True,
                            compute_dtype=jnp.bfloat16, q_block=None):
    """params: dict with wq,bq,wk,bk,wv,bv,wo,bo (weights (E,E), biases (1,E))."""
    if not batch_first:
        # glue: (seq, batch, embed) -> (batch, seq, embed)
        query, key, value = (jnp.swapaxes(x, 0, 1) for x in (query, key, value))

    B, Sq, E = query.shape
    Bk, Sk, Ek = key.shape
    assert Bk == B and Ek == E and value.shape == key.shape
    assert num_heads * head_dim == E

    out_dtype = query.dtype

    # ---- query-tile size; pad the query length so tiling never silently
    # degrades to an unbounded full-S tile for awkward sequence lengths.
    if q_block is None:
        if Sq <= 128:
            q_block = _round_up(Sq, 8)
        elif Sq % 256 == 0:
            q_block = 256
        else:
            q_block = 128
    assert q_block % 8 == 0
    Sq_pad = _round_up(Sq, q_block)
    query_padded = query
    if Sq_pad != Sq:
        query_padded = jnp.pad(query, ((0, 0), (0, Sq_pad - Sq), (0, 0)))

    # ---- one-time weight prep: transposes hoisted out of the kernel,
    # 1/sqrt(head_dim) folded into Wq/bq, optional bf16 cast of MXU operands.
    scale = 1.0 / math.sqrt(head_dim)
    wq_t = (params["wq"].T * scale).astype(compute_dtype)
    bq = (params["bq"] * scale).astype(jnp.float32)
    wk_t = params["wk"].T.astype(compute_dtype)
    wv_t = params["wv"].T.astype(compute_dtype)
    wo_t = params["wo"].T.astype(compute_dtype)
    bk = params["bk"].astype(jnp.float32)
    bv = params["bv"].astype(jnp.float32)
    bo = params["bo"].astype(jnp.float32)

    # ---- generation-aware scoped-VMEM limit (v5e/v6e: ~96MiB, v7x: ~48MiB).
    try:
        vmem_cap = int(pltpu.get_tpu_info().vmem_capacity_bytes)
    except Exception:
        vmem_cap = 64 * 1024 * 1024
    vmem_limit = int(min(vmem_cap * 3 // 4, 100 * 1024 * 1024))

    def run(single_buffer):
        k_proj, v_proj = _project_kv(
            key, value, wk_t, bk, wv_t, bv,
            compute_dtype=compute_dtype, single_buffer=single_buffer,
            vmem_limit=vmem_limit)
        return _attention_call(
            query_padded, k_proj, v_proj, wq_t, bq, wo_t, bo,
            num_heads=num_heads, head_dim=head_dim, need_weights=need_weights,
            compute_dtype=compute_dtype, out_dtype=out_dtype, q_block=q_block,
            single_buffer=single_buffer, vmem_limit=vmem_limit)

    try:
        results = run(True)
    except Exception:
        # pipeline_mode=pl.Buffered(1) not supported by this Pallas build:
        # fall back to default double-buffered specs (correctness unchanged).
        results = run(False)

    out = results[0]
    attn = results[1] if need_weights else None
    if Sq_pad != Sq:
        out = out[:, :Sq, :]
        if attn is not None:
            attn = attn[:, :Sq, :]
    if not batch_first:
        out = jnp.swapaxes(out, 0, 1)
    # attn weights are (B, Lq, Lk) regardless of batch_first, as in PyTorch.
    return out, attn


def _reference_mha(query, key, value, params, num_heads, head_dim):
    """Plain-JAX reference for a sanity check."""
    B, S, E = query.shape
    q = query @ params["wq"].T + params["bq"][0]
    k = key @ params["wk"].T + params["bk"][0]
    v = value @ params["wv"].T + params["bv"][0]
    q = q.reshape(B, S, num_heads, head_dim).transpose(0, 2, 1, 3)
    k = k.reshape(B, S, num_heads, head_dim).transpose(0, 2, 1, 3)
    v = v.reshape(B, S, num_heads, head_dim).transpose(0, 2, 1, 3)
    s = jnp.einsum("bhqd,bhkd->bhqk", q, k) / math.sqrt(head_dim)
    p = jax.nn.softmax(s, axis=-1)
    ctx = jnp.einsum("bhqk,bhkd->bhqd", p, v)
    ctx = ctx.transpose(0, 2, 1, 3).reshape(B, S, E)
    out = ctx @ params["wo"].T + params["bo"][0]
    return out, p.mean(axis=1)


if __name__ == "__main__":
    B, S, E = 2, 8, 32
    num_heads, head_dim = 4, 8

    key0 = jax.random.PRNGKey(0)
    keys = jax.random.split(key0, 12)
    scale = 0.1
    params = {
        "wq": scale * jax.random.normal(keys[0], (E, E), jnp.float32),
        "bq": scale * jax.random.normal(keys[1], (1, E), jnp.float32),
        "wk": scale * jax.random.normal(keys[2], (E, E), jnp.float32),
        "bk": scale * jax.random.normal(keys[3], (1, E), jnp.float32),
        "wv": scale * jax.random.normal(keys[4], (E, E), jnp.float32),
        "bv": scale * jax.random.normal(keys[5], (1, E), jnp.float32),
        "wo": scale * jax.random.normal(keys[6], (E, E), jnp.float32),
        "bo": scale * jax.random.normal(keys[7], (1, E), jnp.float32),
    }

    query = jax.random.normal(keys[8], (B, S, E), jnp.float32)
    key_in = jax.random.normal(keys[9], (B, S, E), jnp.float32)
    value = jax.random.normal(keys[10], (B, S, E), jnp.float32)

    ref_out, ref_attn = _reference_mha(query, key_in, value, params,
                                       num_heads, head_dim)

    # 1) f32 compute path with attention weights (returned weights now use an
    #    exact normalization; approx reciprocal only on the context path).
    out, attn_w = multi_head_attention_cp(
        query, key_in, value, params,
        num_heads=num_heads, head_dim=head_dim,
        batch_first=True, need_weights=True, compute_dtype=jnp.float32)
    jax.block_until_ready((out, attn_w))
    assert out.shape == (B, S, E) and attn_w.shape == (B, S, S)
    assert jnp.allclose(out, ref_out, atol=2e-3, rtol=2e-3)
    assert jnp.allclose(attn_w, ref_attn, atol=2e-3, rtol=2e-3)

    # 2) need_weights=False path (skips the (B,S,S) output entirely).
    out_nw, attn_none = multi_head_attention_cp(
        query, key_in, value, params,
        num_heads=num_heads, head_dim=head_dim,
        batch_first=True, need_weights=False, compute_dtype=jnp.float32)
    jax.block_until_ready(out_nw)
    assert attn_none is None
    assert jnp.allclose(out_nw, ref_out, atol=2e-3, rtol=2e-3)

    # 3) default bf16 MXU-operand path (f32 accumulation / f32 softmax math).
    out_bf, attn_bf = multi_head_attention_cp(
        query, key_in, value, params,
        num_heads=num_heads, head_dim=head_dim,
        batch_first=True, need_weights=True)
    jax.block_until_ready((out_bf, attn_bf))
    assert jnp.allclose(out_bf, ref_out, atol=5e-2, rtol=5e-2)
    assert jnp.allclose(attn_bf, ref_attn, atol=5e-2, rtol=5e-2)

    # 4) seq-first (batch_first=False) glue path.
    out_sf, _ = multi_head_attention_cp(
        jnp.swapaxes(query, 0, 1), jnp.swapaxes(key_in, 0, 1),
        jnp.swapaxes(value, 0, 1), params,
        num_heads=num_heads, head_dim=head_dim,
        batch_first=False, need_weights=False, compute_dtype=jnp.float32)
    jax.block_until_ready(out_sf)
    assert jnp.allclose(jnp.swapaxes(out_sf, 0, 1), ref_out, atol=2e-3, rtol=2e-3)

    # 5) Non-multiple-of-8 sequence length exercises the query-tile padding path.
    Sr = 12
    rkeys = jax.random.split(keys[11], 3)
    q_r = jax.random.normal(rkeys[0], (1, Sr, E), jnp.float32)
    k_r = jax.random.normal(rkeys[1], (1, Sr, E), jnp.float32)
    v_r = jax.random.normal(rkeys[2], (1, Sr, E), jnp.float32)
    ref_out_r, ref_attn_r = _reference_mha(q_r, k_r, v_r, params,
                                           num_heads, head_dim)
    out_r, attn_r = multi_head_attention_cp(
        q_r, k_r, v_r, params,
        num_heads=num_heads, head_dim=head_dim,
        batch_first=True, need_weights=True, compute_dtype=jnp.float32)
    jax.block_until_ready((out_r, attn_r))
    assert out_r.shape == (1, Sr, E) and attn_r.shape == (1, Sr, Sr)
    assert jnp.allclose(out_r, ref_out_r, atol=2e-3, rtol=2e-3)
    assert jnp.allclose(attn_r, ref_attn_r, atol=2e-3, rtol=2e-3)

    print("KERNEL_OK")
</pallas_src>

<mosaic_0001>
module attributes {stable_mosaic.version = 11 : i64} {
  func.func @_kv_proj_kernel(%arg0: i32, %arg1: memref<1x8x32xf32, #tpu.memory_space<vmem>>, %arg2: memref<1x8x32xf32, #tpu.memory_space<vmem>>, %arg3: memref<32x32xf32, #tpu.memory_space<vmem>>, %arg4: memref<1x32xf32, #tpu.memory_space<vmem>>, %arg5: memref<32x32xf32, #tpu.memory_space<vmem>>, %arg6: memref<1x32xf32, #tpu.memory_space<vmem>>, %arg7: memref<1x8x32xf32, #tpu.memory_space<vmem>>, %arg8: memref<1x8x32xf32, #tpu.memory_space<vmem>>) attributes {dimension_semantics = [#tpu.dimension_semantics<parallel>], iteration_bounds = array<i64: 2>, scalar_prefetch = 0 : i64, scratch_operands = 0 : i64, tpu.core_type = #tpu.core_type<tc>, window_params = [{transform_indices = @transform_0, window_bounds = array<i64: 1, 8, 32>}, {transform_indices = @transform_1, window_bounds = array<i64: 1, 8, 32>}, {pipeline_mode = #tpu.pipeline_mode<synchronous>, transform_indices = @transform_2, window_bounds = array<i64: 32, 32>}, {pipeline_mode = #tpu.pipeline_mode<synchronous>, transform_indices = @transform_3, window_bounds = array<i64: 1, 32>}, {pipeline_mode = #tpu.pipeline_mode<synchronous>, transform_indices = @transform_4, window_bounds = array<i64: 32, 32>}, {pipeline_mode = #tpu.pipeline_mode<synchronous>, transform_indices = @transform_5, window_bounds = array<i64: 1, 32>}, {transform_indices = @transform_6, window_bounds = array<i64: 1, 8, 32>}, {transform_indices = @transform_7, window_bounds = array<i64: 1, 8, 32>}]} {
    %c0 = arith.constant 0 : index
    %c0_0 = arith.constant 0 : index
    %c0_1 = arith.constant 0 : index
    %0 = vector.load %arg1[%c0, %c0_0, %c0_1] : memref<1x8x32xf32, #tpu.memory_space<vmem>>, vector<1x8x32xf32>
    %1 = vector.shape_cast %0 : vector<1x8x32xf32> to vector<8x32xf32>
    %c0_2 = arith.constant 0 : index
    %c0_3 = arith.constant 0 : index
    %c0_4 = arith.constant 0 : index
    %2 = vector.load %arg2[%c0_2, %c0_3, %c0_4] : memref<1x8x32xf32, #tpu.memory_space<vmem>>, vector<1x8x32xf32>
    %3 = vector.shape_cast %2 : vector<1x8x32xf32> to vector<8x32xf32>
    %c0_5 = arith.constant 0 : index
    %c0_6 = arith.constant 0 : index
    %4 = vector.load %arg3[%c0_5, %c0_6] : memref<32x32xf32, #tpu.memory_space<vmem>>, vector<32x32xf32>
    %cst = arith.constant dense<0.000000e+00> : vector<8x32xf32>
    %5 = tpu.matmul %1, %4, %cst {dimension_numbers = #tpu.dot_dimension_numbers<[1], [0], [0], [1], [0, 0, 1, 1], [], []>} : vector<8x32xf32>, vector<32x32xf32>, vector<8x32xf32> -> vector<8x32xf32>
    %c0_7 = arith.constant 0 : index
    %c0_8 = arith.constant 0 : index
    %6 = vector.load %arg4[%c0_7, %c0_8] : memref<1x32xf32, #tpu.memory_space<vmem>>, vector<1x32xf32>
    %7 = vector.shape_cast %6 : vector<1x32xf32> to vector<32xf32>
    %8 = vector.shape_cast %7 : vector<32xf32> to vector<1x32xf32>
    %9 = vector.broadcast %8 : vector<1x32xf32> to vector<8x32xf32>
    %10 = arith.addf %5, %9 : vector<8x32xf32>
    %c0_9 = arith.constant 0 : index
    %c0_10 = arith.constant 0 : index
    %11 = vector.load %arg5[%c0_9, %c0_10] : memref<32x32xf32, #tpu.memory_space<vmem>>, vector<32x32xf32>
    %cst_11 = arith.constant dense<0.000000e+00> : vector<8x32xf32>
    %12 = tpu.matmul %3, %11, %cst_11 {dimension_numbers = #tpu.dot_dimension_numbers<[1], [0], [0], [1], [0, 0, 1, 1], [], []>} : vector<8x32xf32>, vector<32x32xf32>, vector<8x32xf32> -> vector<8x32xf32>
    %c0_12 = arith.constant 0 : index
    %c0_13 = arith.constant 0 : index
    %13 = vector.load %arg6[%c0_12, %c0_13] : memref<1x32xf32, #tpu.memory_space<vmem>>, vector<1x32xf32>
    %14 = vector.shape_cast %13 : vector<1x32xf32> to vector<32xf32>
    %15 = vector.shape_cast %14 : vector<32xf32> to vector<1x32xf32>
    %16 = vector.broadcast %15 : vector<1x32xf32> to vector<8x32xf32>
    %17 = arith.addf %12, %16 : vector<8x32xf32>
    %c0_14 = arith.constant 0 : index
    %c0_15 = arith.constant 0 : index
    %c0_16 = arith.constant 0 : index
    %18 = vector.load %arg7[%c0_14, %c0_15, %c0_16] : memref<1x8x32xf32, #tpu.memory_space<vmem>>, vector<1x8x32xf32>
    %19 = vector.shape_cast %18 : vector<1x8x32xf32> to vector<8x32xf32>
    %20 = vector.shape_cast %10 : vector<8x32xf32> to vector<1x8x32xf32>
    tpu.vector_store %arg7[%c0_14, %c0_15, %c0_16], %20 {strides = array<i32>} : memref<1x8x32xf32, #tpu.memory_space<vmem>>, vector<1x8x32xf32>,
    %c0_17 = arith.constant 0 : index
    %c0_18 = arith.constant 0 : index
    %c0_19 = arith.constant 0 : index
    %21 = vector.load %arg8[%c0_17, %c0_18, %c0_19] : memref<1x8x32xf32, #tpu.memory_space<vmem>>, vector<1x8x32xf32>
    %22 = vector.shape_cast %21 : vector<1x8x32xf32> to vector<8x32xf32>
    %23 = vector.shape_cast %17 : vector<8x32xf32> to vector<1x8x32xf32>
    tpu.vector_store %arg8[%c0_17, %c0_18, %c0_19], %23 {strides = array<i32>} : memref<1x8x32xf32, #tpu.memory_space<vmem>>, vector<1x8x32xf32>,
    return
  }
  func.func @transform_0(%arg0: i32) -> (i32, i32, i32) {
    %c0_i32 = arith.constant 0 : i32
    %c0_i32_0 = arith.constant 0 : i32
    %c0_i32_1 = arith.constant 0 : i32
    return %arg0, %c0_i32, %c0_i32_0 : i32, i32, i32
  }
  func.func @transform_1(%arg0: i32) -> (i32, i32, i32) {
    %c0_i32 = arith.constant 0 : i32
    %c0_i32_0 = arith.constant 0 : i32
    %c0_i32_1 = arith.constant 0 : i32
    return %arg0, %c0_i32, %c0_i32_0 : i32, i32, i32
  }
  func.func @transform_2(%arg0: i32) -> (i32, i32) {
    %c0_i32 = arith.constant 0 : i32
    %c0_i32_0 = arith.constant 0 : i32
    %c0_i32_1 = arith.constant 0 : i32
    return %c0_i32, %c0_i32_0 : i32, i32
  }
  func.func @transform_3(%arg0: i32) -> (i32, i32) {
    %c0_i32 = arith.constant 0 : i32
    %c0_i32_0 = arith.constant 0 : i32
    %c0_i32_1 = arith.constant 0 : i32
    return %c0_i32, %c0_i32_0 : i32, i32
  }
  func.func @transform_4(%arg0: i32) -> (i32, i32) {
    %c0_i32 = arith.constant 0 : i32
    %c0_i32_0 = arith.constant 0 : i32
    %c0_i32_1 = arith.constant 0 : i32
    return %c0_i32, %c0_i32_0 : i32, i32
  }
  func.func @transform_5(%arg0: i32) -> (i32, i32) {
    %c0_i32 = arith.constant 0 : i32
    %c0_i32_0 = arith.constant 0 : i32
    %c0_i32_1 = arith.constant 0 : i32
    return %c0_i32, %c0_i32_0 : i32, i32
  }
  func.func @transform_6(%arg0: i32) -> (i32, i32, i32) {
    %c0_i32 = arith.constant 0 : i32
    %c0_i32_0 = arith.constant 0 : i32
    %c0_i32_1 = arith.constant 0 : i32
    return %arg0, %c0_i32, %c0_i32_0 : i32, i32, i32
  }
  func.func @transform_7(%arg0: i32) -> (i32, i32, i32) {
    %c0_i32 = arith.constant 0 : i32
    %c0_i32_0 = arith.constant 0 : i32
    %c0_i32_1 = arith.constant 0 : i32
    return %arg0, %c0_i32, %c0_i32_0 : i32, i32, i32
  }
}

module attributes {stable_mosaic.version = 11 : i64} {
  func.func @_kv_proj_kernel(%arg0: i32, %arg1: memref<1x8x32xf32, #tpu.memory_space<vmem>>, %arg2: memref<1x8x32xf32, #tpu.memory_space<vmem>>, %arg3: memref<32x32xf32, #tpu.memory_space<vmem>>, %arg4: memref<1x32xf32, #tpu.memory_space<vmem>>, %arg5: memref<32x32xf32, #tpu.memory_space<vmem>>, %arg6: memref<1x32xf32, #tpu.memory_space<vmem>>, %arg7: memref<1x8x32xf32, #tpu.memory_space<vmem>>, %arg8: memref<1x8x32xf32, #tpu.memory_space<vmem>>) attributes {dimension_semantics = [#tpu.dimension_semantics<parallel>], iteration_bounds = array<i64: 2>, scalar_prefetch = 0 : i64, scratch_operands = 0 : i64, tpu.core_type = #tpu.core_type<tc>, window_params = [{transform_indices = @transform_0, window_bounds = array<i64: 1, 8, 32>}, {transform_indices = @transform_1, window_bounds = array<i64: 1, 8, 32>}, {pipeline_mode = #tpu.pipeline_mode<synchronous>, transform_indices = @transform_2, window_bounds = array<i64: 32, 32>}, {pipeline_mode = #tpu.pipeline_mode<synchronous>, transform_indices = @transform_3, window_bounds = array<i64: 1, 32>}, {pipeline_mode = #tpu.pipeline_mode<synchronous>, transform_indices = @transform_4, window_bounds = array<i64: 32, 32>}, {pipeline_mode = #tpu.pipeline_mode<synchronous>, transform_indices = @transform_5, window_bounds = array<i64: 1, 32>}, {transform_indices = @transform_6, window_bounds = array<i64: 1, 8, 32>}, {transform_indices = @transform_7, window_bounds = array<i64: 1, 8, 32>}]} {
    %c0 = arith.constant 0 : index
    %c0_0 = arith.constant 0 : index
    %c0_1 = arith.constant 0 : index
    %0 = vector.load %arg1[%c0, %c0_0, %c0_1] : memref<1x8x32xf32, #tpu.memory_space<vmem>>, vector<1x8x32xf32>
    %1 = vector.shape_cast %0 : vector<1x8x32xf32> to vector<8x32xf32>
    %c0_2 = arith.constant 0 : index
    %c0_3 = arith.constant 0 : index
    %c0_4 = arith.constant 0 : index
    %2 = vector.load %arg2[%c0_2, %c0_3, %c0_4] : memref<1x8x32xf32, #tpu.memory_space<vmem>>, vector<1x8x32xf32>
    %3 = vector.shape_cast %2 : vector<1x8x32xf32> to vector<8x32xf32>
    %c0_5 = arith.constant 0 : index
    %c0_6 = arith.constant 0 : index
    %4 = vector.load %arg3[%c0_5, %c0_6] : memref<32x32xf32, #tpu.memory_space<vmem>>, vector<32x32xf32>
    %cst = arith.constant dense<0.000000e+00> : vector<8x32xf32>
    %5 = tpu.matmul %1, %4, %cst {dimension_numbers = #tpu.dot_dimension_numbers<[1], [0], [0], [1], [0, 0, 1, 1], [], []>} : vector<8x32xf32>, vector<32x32xf32>, vector<8x32xf32> -> vector<8x32xf32>
    %c0_7 = arith.constant 0 : index
    %c0_8 = arith.constant 0 : index
    %6 = vector.load %arg4[%c0_7, %c0_8] : memref<1x32xf32, #tpu.memory_space<vmem>>, vector<1x32xf32>
    %7 = vector.shape_cast %6 : vector<1x32xf32> to vector<32xf32>
    %8 = vector.shape_cast %7 : vector<32xf32> to vector<1x32xf32>
    %9 = vector.broadcast %8 : vector<1x32xf32> to vector<8x32xf32>
    %10 = arith.addf %5, %9 : vector<8x32xf32>
    %c0_9 = arith.constant 0 : index
    %c0_10 = arith.constant 0 : index
    %11 = vector.load %arg5[%c0_9, %c0_10] : memref<32x32xf32, #tpu.memory_space<vmem>>, vector<32x32xf32>
    %cst_11 = arith.constant dense<0.000000e+00> : vector<8x32xf32>
    %12 = tpu.matmul %3, %11, %cst_11 {dimension_numbers = #tpu.dot_dimension_numbers<[1], [0], [0], [1], [0, 0, 1, 1], [], []>} : vector<8x32xf32>, vector<32x32xf32>, vector<8x32xf32> -> vector<8x32xf32>
    %c0_12 = arith.constant 0 : index
    %c0_13 = arith.constant 0 : index
    %13 = vector.load %arg6[%c0_12, %c0_13] : memref<1x32xf32, #tpu.memory_space<vmem>>, vector<1x32xf32>
    %14 = vector.shape_cast %13 : vector<1x32xf32> to vector<32xf32>
    %15 = vector.shape_cast %14 : vector<32xf32> to vector<1x32xf32>
    %16 = vector.broadcast %15 : vector<1x32xf32> to vector<8x32xf32>
    %17 = arith.addf %12, %16 : vector<8x32xf32>
    %c0_14 = arith.constant 0 : index
    %c0_15 = arith.constant 0 : index
    %c0_16 = arith.constant 0 : index
    %18 = vector.load %arg7[%c0_14, %c0_15, %c0_16] : memref<1x8x32xf32, #tpu.memory_space<vmem>>, vector<1x8x32xf32>
    %19 = vector.shape_cast %18 : vector<1x8x32xf32> to vector<8x32xf32>
    %20 = vector.shape_cast %10 : vector<8x32xf32> to vector<1x8x32xf32>
    tpu.vector_store %arg7[%c0_14, %c0_15, %c0_16], %20 {strides = array<i32>} : memref<1x8x32xf32, #tpu.memory_space<vmem>>, vector<1x8x32xf32>,
    %c0_17 = arith.constant 0 : index
    %c0_18 = arith.constant 0 : index
    %c0_19 = arith.constant 0 : index
    %21 = vector.load %arg8[%c0_17, %c0_18, %c0_19] : memref<1x8x32xf32, #tpu.memory_space<vmem>>, vector<1x8x32xf32>
    %22 = vector.shape_cast %21 : vector<1x8x32xf32> to vector<8x32xf32>
    %23 = vector.shape_cast %17 : vector<8x32xf32> to vector<1x8x32xf32>
    tpu.vector_store %arg8[%c0_17, %c0_18, %c0_19], %23 {strides = array<i32>} : memref<1x8x32xf32, #tpu.memory_space<vmem>>, vector<1x8x32xf32>,
    return
  }
  func.func @transform_0(%arg0: i32) -> (i32, i32, i32) {
    %c0_i32 = arith.constant 0 : i32
    %c0_i32_0 = arith.constant 0 : i32
    %c0_i32_1 = arith.constant 0 : i32
    return %arg0, %c0_i32, %c0_i32_0 : i32, i32, i32
  }
  func.func @transform_1(%arg0: i32) -> (i32, i32, i32) {
    %c0_i32 = arith.constant 0 : i32
    %c0_i32_0 = arith.constant 0 : i32
    %c0_i32_1 = arith.constant 0 : i32
    return %arg0, %c0_i32, %c0_i32_0 : i32, i32, i32
  }
  func.func @transform_2(%arg0: i32) -> (i32, i32) {
    %c0_i32 = arith.constant 0 : i32
    %c0_i32_0 = arith.constant 0 : i32
    %c0_i32_1 = arith.constant 0 : i32
    return %c0_i32, %c0_i32_0 : i32, i32
  }
  func.func @transform_3(%arg0: i32) -> (i32, i32) {
    %c0_i32 = arith.constant 0 : i32
    %c0_i32_0 = arith.constant 0 : i32
    %c0_i32_1 = arith.constant 0 : i32
    return %c0_i32, %c0_i32_0 : i32, i32
  }
  func.func @transform_4(%arg0: i32) -> (i32, i32) {
    %c0_i32 = arith.constant 0 : i32
    %c0_i32_0 = arith.constant 0 : i32
    %c0_i32_1 = arith.constant 0 : i32
    return %c0_i32, %c0_i32_0 : i32, i32
  }
  func.func @transform_5(%arg0: i32) -> (i32, i32) {
    %c0_i32 = arith.constant 0 : i32
    %c0_i32_0 = arith.constant 0 : i32
    %c0_i32_1 = arith.constant 0 : i32
    return %c0_i32, %c0_i32_0 : i32, i32
  }
  func.func @transform_6(%arg0: i32) -> (i32, i32, i32) {
    %c0_i32 = arith.constant 0 : i32
    %c0_i32_0 = arith.constant 0 : i32
    %c0_i32_1 = arith.constant 0 : i32
    return %arg0, %c0_i32, %c0_i32_0 : i32, i32, i32
  }
  func.func @transform_7(%arg0: i32) -> (i32, i32, i32) {
    %c0_i32 = arith.constant 0 : i32
    %c0_i32_0 = arith.constant 0 : i32
    %c0_i32_1 = arith.constant 0 : i32
    return %arg0, %c0_i32, %c0_i32_0 : i32, i32, i32
  }
}

</mosaic_0001>

<bundles_post_ra>
// kernel: tpu_custom_call.1
= control target key start
LH: loop header
LB: loop body
LE: loop exit
PB: predicated region body
PF: predicated region fallthrough
CT: control target
= control target key end

     0   :  { %s1225_s0 = inlined_call_operand.hbm [shape: f32[2,8,32], index: 0, kind: input, shape index: {}]   ;;  %s1226_s1 = inlined_call_operand.hbm [shape: f32[2,8,32], index: 1, kind: input, shape index: {}]   ;;  %s1227_s2 = inlined_call_operand.hbm [shape: f32[32,32], index: 2, kind: input, shape index: {}]   ;;  %s1228_s3 = inlined_call_operand.vmem [shape: f32[1,32], index: 3, kind: input, shape index: {}]   ;;  %s1229_s4 = inlined_call_operand.hbm [shape: f32[32,32], index: 4, kind: input, shape index: {}]   ;;  %s1230_s5 = inlined_call_operand.vmem [shape: f32[1,32], index: 5, kind: input, shape index: {}]   ;;  %s1231_s6 = inlined_call_operand.hbm [shape: f32[2,8,32], index: 6, kind: output, shape index: {0}]   ;;  %s1232_s7 = inlined_call_operand.hbm [shape: f32[2,8,32], index: 7, kind: output, shape index: {1}]  }
   0x1   :  { %1237 = sst [smem:[#allocation23_spill]] %s1227_s2 }
   0x2   :  { %1238 = sst [smem:[#allocation24_spill]] %s1229_s4 }
   0x3   :  { %13 = vsyncpa [#allocation3], 0 }
   0x4   :  { %15 = vsyncpa [#allocation3 + $0x1], 0 }
   0x5   :  { %16 = vsyncpa [#allocation6], 0 }
   0x6   :  { %18 = vsyncpa [#allocation6 + $0x1], 0 }
   0x7   :  { %19 = vsyncpa [#allocation9], 0 }
   0x8   :  { %20 = vsyncpa [#allocation4], 0 }
   0x9   :  { %22 = vsyncpa [#allocation4 + $0x1], 0 }
   0xa   :  { %23 = vsyncpa [#allocation12], 0 }
   0xb   :  { %25 = vsyncpa [#allocation12 + $0x1], 0  ;;  %s1007_s24 = smov 0   ;;  %s1009_s25 = smov 0  }
   0xc   :  { %s1011_s26 = smov 0   ;;  %s1013_s27 = smov 0  }
   0xd LB: > { %1239 = sst [smem:[#allocation19_spill]] %s957_s26  ;;  %s1031_s8 = sadd.s32 4294967295, %s961_s27   ;;  %s961_s27 = sphi %s1013_s27, %s1253_s27   ;;  %s957_s26 = sphi %s1011_s26, %s1255_s26   ;;  %s953_s25 = sphi %s1009_s25, %s1257_s25   ;;  %s949_s24 = sphi %s1007_s24, %s1256_s24  }
   0xe   : > { %1240 = sst [smem:[#allocation20_spill]] %s961_s27  ;;  %p627_p0 = scmp.ge.s32.totalorder %s961_s27, 1 }
   0xf   : > { %s1241_s2 = sld [smem:[#allocation23_spill]]  ;;  %p52_p1 = scmp.eq.s32.totalorder %s1031_s8, 0 }
  0x10   : > { %p224_p2 = scmp.lt.s32.totalorder %s961_s27, 3  ;;  %s963_s10 = smov [#allocation7]  }
  0x11   : > { %s237_s11 = sshll.u32 %s963_s10, 4  ;;  %s1243_s4 = sld [smem:[#allocation24_spill]]  ;;  %s238_s11 = int_to_ptr.vmem [resolvable:$true] %s237_s11 }
  0x12   : > { %p1036_p3 = pnand %p627_p0, %p224_p2  ;;  %s964_s15 = smov [#allocation8]  }
  0x13   : > { %s254_s16 = sshll.u32 %s964_s15, 4  ;;  %s965_s17 = smov 128   ;;  %s255_s16 = int_to_ptr.vmem [resolvable:$true] %s254_s16 }
  0x14   : > { %p666_p4 = pneg %p1036_p3  ;;  %s966_s18 = smov 8  }
  0x15   : > { %s235_s30 = sshll.u32 %s1241_s2, 4  ;;  %s626_s19 = sadd.s32 4294967294, %s961_s27   ;;  %s236_s30 = int_to_ptr.hbm [resolvable:$true] %s235_s30 }
  0x16   : > { %p667_p6 = pnand %p666_p4, %p52_p1  ;;  %s1050_s20 = sadd.s32 1, %s961_s27  }
  0x17   : > { %s252_s14 = sshll.u32 %s1243_s4, 4  ;;  %1244 = sst [smem:[#allocation21_spill]] %s1050_s20  ;;  %s253_s14 = int_to_ptr.hbm [resolvable:$true] %s252_s14 }
  0x18   : > { %669 = dma.hbm_to_vmem [thread:$0]  (!%p667_p6), %s236_s30, 512, %s238_s11, [#allocation6], %s965_s17, %s965_s17, %s966_s18  }
  0x19   : > { %672 = dma.hbm_to_vmem [thread:$0]  (!%p667_p6), %s253_s14, 512, %s255_s16, [#allocation9], %s965_s17, %s965_s17, %s966_s18  }
  0x1a   : > { %s35_s21 = ssub.s32 %s961_s27, %s1050_s20  ;;  %s38_s22 = sadd.s32 1, %s957_s26 }
  0x1b   : > { %p36_p7 = scmp.eq.s32.totalorder %s35_s21, 0  ;;  %p45_p8 = scmp.ne.s32.totalorder %s957_s26, %s953_s25 }
  0x1c   : > { %p46_p9 = scmp.eq.s32.totalorder %s961_s27, 0  ;;  %p51_p10 = scmp.ne.s32.totalorder %s953_s25, %s949_s24 }
  0x1d   : > { %s1061_s23 = scalar_select %p36_p7, %s957_s26, %s38_s22  }
  0x1e   : > { %p1063_p11 = por %p46_p9, %p45_p8  ;;  %p1069_p12 = por %p52_p1, %p51_p10 }
  0x1f   : > { %1245 = sst [smem:[#allocation22_spill]] %s1061_s23  ;;  %p185_p13 = scmp.eq.s32.totalorder %s1031_s8, 1 }
  0x20   : > { %p191_p0 = scmp.eq.s32.totalorder %s626_s19, 1  ;;  %p689_p2 = scmp.lt.s32.totalorder %s961_s27, 2 }
  0x21   : > { %s271_s30 = sand.u32 1, %s957_s26   ;;  %p1076_p4 = por %p185_p13, %p45_p8 }
  0x22   : > { %p1080_p6 = por %p191_p0, %p51_p10  ;;  %s1084_s12 = sshll.u32 %s271_s30, 3 }
  0x23   : > { %s632_s13 = sshll.u32 %s961_s27, 3  ;;  %s275_s17 = scalar_lea.vmem [#allocation2], %s1084_s12 }
  0x24   : > { %s279_s16 = scalar_lea.hbm %s1225_s0, %s632_s13  ;;  %s283_s18 = sshll.u32 %s275_s17, 4  ;;  %s284_s18 = int_to_ptr.vmem [resolvable:$true] %s283_s18 }
  0x25   : > { %s281_s19 = sshll.u32 %s279_s16, 4  ;;  %p1093_p7 = pnand %p689_p2, %p1063_p11  ;;  %s282_s19 = int_to_ptr.hbm [resolvable:$true] %s281_s19 }
  0x26   : > { %s298_s4 = scalar_lea.hbm %s1226_s1, %s632_s13  ;;  %s290_s23 = sand.u32 1, %s961_s27  }
  0x27   : > { %s272_s26 = scalar_lea.sflag [#allocation3], %s271_s30  ;;  %s791_s14 = sshra.s32 %s282_s19, 4  ;;  %s792_s14 = int_to_ptr.hbm [resolvable:$true] %s791_s14 }
  0x28   : > { %s793_s15 = scalar_lea.hbm %s792_s14, 8  ;;  %p795_p9 = pneg %p1093_p7 }
  0x29   : > { %p794_p8 = scmp.ne.s32.totalorder %s792_s14, %s793_s15  ;;  %s798_s17 = scalar_lea.hbm %s1225_s0, 16 }
  0x2a   : > { %p799_p13 = scmp.lt.s32.totalorder %s792_s14, %s1225_s0  ;;  %p800_p0 = scmp.lt.s32.totalorder %s798_s17, %s793_s15 }
  0x2b   : > { %p796_p10 = pnand %p795_p9, %p794_p8 }
  0x2c   : > { %p801_p2 = por %p800_p0, %p799_p13 }
  0x2d   : > { %p797_p11 = pneg %p796_p10 }
  0x2f   : > { %p802_p5 = pnand %p801_p2, %p797_p11 }
  0x31   : > { %805 = shalt.err (!%p802_p5)
}
  0x32   : > { %676 = dma.hbm_to_vmem [thread:$0]  (!%p1093_p7), %s282_s19, 128, %s284_s18, %s272_s26  }
  0x33   : > { %s300_s30 = sshll.u32 %s298_s4, 4  ;;  %s294_s13 = scalar_lea.vmem [#allocation5], %s1084_s12  ;;  %s301_s30 = int_to_ptr.hbm [resolvable:$true] %s300_s30 }
  0x34   : > { %s302_s20 = sshll.u32 %s294_s13, 4  ;;  %s291_s28 = scalar_lea.sflag [#allocation6], %s290_s23  ;;  %s303_s20 = int_to_ptr.vmem [resolvable:$true] %s302_s20 }
  0x35   : > { %s821_s16 = sshra.s32 %s301_s30, 4  ;;  %s828_s17 = scalar_lea.hbm %s1226_s1, 16  ;;  %s822_s16 = int_to_ptr.hbm [resolvable:$true] %s821_s16 }
  0x36   : > { %s823_s27 = scalar_lea.hbm %s822_s16, 8  ;;  %p829_p5 = scmp.lt.s32.totalorder %s822_s16, %s1226_s1 }
  0x37   : > { %p824_p8 = scmp.ne.s32.totalorder %s822_s16, %s823_s27  ;;  %p830_p13 = scmp.lt.s32.totalorder %s828_s17, %s823_s27 }
  0x39   : > { %p826_p10 = pnand %p824_p8, %p795_p9  ;;  %p831_p0 = por %p830_p13, %p829_p5 }
  0x3b   : > { %p827_p11 = pneg %p826_p10 }
  0x3d   : > { %p832_p2 = pnand %p831_p0, %p827_p11 }
  0x3f   : > { %835 = shalt.err (!%p832_p2)
}
  0x40   : > { %679 = dma.hbm_to_vmem [thread:$0]  (!%p1093_p7), %s301_s30, 128, %s303_s20, %s291_s28  }
  0x41   : > { %311 = sbr.rel (%p1036_p3) target bundleno = 229 (0xe5), region = 44  ;;  %s1129_s4 = sand.u32 (!%p1036_p3), 1, %s953_s25  }
  0x42   : > { %s1132_s23 = sshll.u32 (!%p1036_p3), %s1129_s4, 3  ;;  %s314_s12 = scalar_lea.sflag (!%p1036_p3), [#allocation3], %s1129_s4 }
  0x43   : > { %s317_s27 = scalar_lea.vmem (!%p1036_p3), [#allocation2], %s1132_s23 }
  0x46   : > { %924 = dma.done.wait (%p1069_p12), %s314_s12, 128  }
  0x47   : > { %926 = vsyncadd (%p1069_p12), %s314_s12, 4294967168  ;;  %s323_s9 = sand.u32 1, %s1031_s8   ;;  %s327_s18 = scalar_lea.vmem [#allocation5], %s1132_s23 }
  0x48   : > { %s324_s20 = scalar_lea.sflag [#allocation6], %s323_s9 }
  0x49   : > { %928 = dma.done.wait (%p1069_p12), %s324_s20, 128  }
  0x4a   : > { %930 = vsyncadd (%p1069_p12), %s324_s20, 4294967168 }
  0x4b   : > { %932 = dma.done.wait (%p52_p1), [#allocation6], 512  }
  0x4c   : > { %934 = vsyncadd (%p52_p1), [#allocation6], 4294966784 }
  0x4d   : > { %936 = dma.done.wait (%p52_p1), [#allocation9], 512  }
  0x4e   : > { %938 = vsyncadd (%p52_p1), [#allocation9], 4294966784  ;;  %v384_v0 = vld [vmem:[#allocation7 + $0x18] sm:$0xff]  ;;  %v383_v2 = vld [vmem:[#allocation7 + $0x10] sm:$0xff]  ;;  %vm389_vm0 = vcmask 261120   ;;  %s646_s29 = sshll.u32 %s1031_s8, 3 }
  0x4f   : > { %v416_v1 = vld [vmem:[#allocation8 + $0x18] sm:$0xff]  ;;  %405 = vmatpush.msra.mxu0 %v384_v0  ;;  %v415_v3 = vld [vmem:[#allocation8 + $0x10] sm:$0xff]  ;;  %v382_v4 = vld [vmem:[#allocation7 + $0x8] sm:$0xff]  ;;  %s462_s22 = scalar_lea.hbm %s1231_s6, %s646_s29  ;;  %s476_s28 = scalar_lea.hbm %s1232_s7, %s646_s29 }
  0x50   : > { %436 = vmatpush.msra.mxu1 %v416_v1  ;;  %v414_v5 = vld [vmem:[#allocation8 + $0x8] sm:$0xff]  ;;  %v381_v6 = vld [vmem:[#allocation7] sm:$0xff]  ;;  %v380_v9 = vld [vmem:[%s327_s18] sm:$0xff]  ;;  %s371_s2 = scalar_lea.vmem [#allocation10], %s1132_s23  ;;  %s466_s8 = sshll.u32 %s462_s22, 4  ;;  %s467_s8 = int_to_ptr.hbm [resolvable:$true] %s466_s8 }
  0x51   : > { %406 = vmatpush.msra.mxu0 %v383_v2  ;;  %v413_v7 = vld [vmem:[#allocation8] sm:$0xff]  ;;  %s1170_s26 = sshll.u32 %s371_s2, 4  ;;  %s378_s12 = scalar_lea.vmem [#allocation11], %s1132_s23  ;;  %s465_s26 = int_to_ptr.vmem [resolvable:$true] %s1170_s26 }
  0x52   : > { %437 = vmatpush.msra.mxu1 %v415_v3  ;;  %v379_v8 = vld [vmem:[%s317_s27] sm:$0xff]  ;;  %s1173_s27 = sshll.u32 %s378_s12, 4  ;;  %s480_s9 = sshll.u32 %s476_s28, 4  ;;  %s479_s27 = int_to_ptr.vmem [resolvable:$true] %s1173_s27  ;;  %s1177_s9 = int_to_ptr.hbm [resolvable:$true] %s480_s9 }
  0x53   : > { %407 = vmatpush.msra.mxu0 %v382_v4  ;;  %v729_v10 = vld [vmem:[%s1228_s3] ss:$0 sm:$0xff]  ;;  %s447_s20 = scalar_lea.sflag [#allocation4], %s1129_s4  ;;  %s865_s18 = sshra.s32 %s467_s8, 4  ;;  %s866_s18 = int_to_ptr.hbm [resolvable:$true] %s865_s18 }
  0x54   : > { %438 = vmatpush.msra.mxu1 %v414_v5  ;;  %v730_v11 = vld [vmem:[%s1230_s5] ss:$0 sm:$0xff]  ;;  %s867_s23 = scalar_lea.hbm %s866_s18, 8  ;;  %s871_s21 = scalar_lea.hbm %s1231_s6, 16 }
  0x55   : > { %408 = vmatpush.msra.mxu0 %v381_v6  ;;  %p868_p1 = scmp.ne.s32.totalorder %s866_s18, %s867_s23  ;;  %p872_p7 = scmp.lt.s32.totalorder %s866_s18, %s1231_s6 }
  0x56   : > { %439 = vmatpush.msra.mxu1 %v413_v7  ;;  %642 = vmatmul.msk.f32.vlgmr.msra.gmra.mxu0 %vm389_vm0, %v379_v8  ;;  %p873_p9 = scmp.lt.s32.totalorder %s871_s21, %s867_s23 }
  0x57   : > { %643 = vmatmul.msk.f32.vlgmr.msra.gmra.mxu1 %vm389_vm0, %v380_v9  ;;  %p869_p3 = pnand %p868_p1, %p1076_p4 }
  0x58   : > { %p874_p8 = por %p873_p9, %p872_p7 }
  0x59   : > { %p870_p12 = pneg %p869_p3 }
  0x5b   : > { %p875_p10 = pnand %p874_p8, %p870_p12 }
  0xd3   : > { %v410_v12 = vpop.f32.mrf.mxu0 }
  0xd4   : > { %v441_v13 = vpop.f32.mrf.mxu1  ;;  %v411_v14 = vadd.f32 %v729_v10, %v410_v12 }
  0xd5   : > { %v442_v15 = vadd.f32 %v730_v11, %v441_v13 }
  0xd6   : > { %444 = vst.msk [vmem:[%s371_s2] sm:$0xff] %vm389_vm0, %v411_v14 }
  0xd7   : > { %878 = shalt.err (!%p875_p10)
}
  0xd8   : > { %662 = dma.vmem_to_hbm [thread:$0]  (%p1076_p4), %s465_s26, 128, %s467_s8, %s447_s20   ;;  %445 = vst.msk [vmem:[%s378_s12] sm:$0xff] %vm389_vm0, %v442_v15 }
  0xd9   : > { %s452_s13 = scalar_lea.sflag [#allocation12], %s1129_s4  ;;  %s893_s28 = sshra.s32 %s1177_s9, 4  ;;  %s894_s28 = int_to_ptr.hbm [resolvable:$true] %s893_s28 }
  0xda   : > { %s895_s16 = scalar_lea.hbm %s894_s28, 8  ;;  %s899_s17 = scalar_lea.hbm %s1232_s7, 16 }
  0xdb   : > { %p896_p11 = scmp.ne.s32.totalorder %s894_s28, %s895_s16  ;;  %p900_p0 = scmp.lt.s32.totalorder %s894_s28, %s1232_s7 }
  0xdc   : > { %p901_p2 = scmp.lt.s32.totalorder %s899_s17, %s895_s16 }
  0xdd   : > { %p897_p5 = pnand %p896_p11, %p1076_p4 }
  0xde   : > { %p902_p1 = por %p901_p2, %p900_p0 }
  0xdf   : > { %p898_p13 = pneg %p897_p5 }
  0xe1   : > { %p903_p3 = pnand %p902_p1, %p898_p13 }
  0xe3   : > { %906 = shalt.err (!%p903_p3)
}
  0xe4   : > { %663 = dma.vmem_to_hbm [thread:$0]  (%p1076_p4), %s479_s27, 128, %s1177_s9, %s452_s13  }
  0xe5 PF: > { %s1251_s4 = sld [smem:[#allocation20_spill]]  ;;  %s492_s26 = sand.u32 1, %s949_s24  }
  0xe6   : > { %s493_s8 = scalar_lea.sflag [#allocation4], %s492_s26 }
  0xeb   : > { %p1252_p12 = scmp.ge.s32.totalorder %s1251_s4, 2 }
  0xed   : > { %p681_p7 = pnand %p1252_p12, %p1080_p6 }
  0xef   : > { %p682_p9 = pneg %p681_p7 }
  0xf1   : > { %940 = dma.done.wait (%p682_p9), %s493_s8, 128  }
  0xf2   : > { %942 = vsyncadd (%p682_p9), %s493_s8, 4294967168  ;;  %s503_s12 = scalar_lea.sflag [#allocation12], %s492_s26 }
  0xf3   : > { %944 = dma.done.wait (%p682_p9), %s503_s12, 128  }
  0xf4   : > { %946 = vsyncadd (%p682_p9), %s503_s12, 4294967168  ;;  %s1253_s27 = sld [smem:[#allocation21_spill]]  ;;  %s1256_s24 = smov %s953_s25 }
  0xf5   : > { %s1254_s10 = sld [smem:[#allocation19_spill]] }
  0xf6   : > { %s1255_s26 = sld [smem:[#allocation22_spill]] }
  0xfa   : > { %p28_p4 = scmp.ge.s32.totalorder %s1253_s27, 4  }
  0xfb   : > { %s1257_s25 = smov %s1254_s10 }
  0xfc   :  { %30 = sbr.rel (!%p28_p4) target bundleno = 13 (0xd), region = 127 }
 0x101   :  { %509 = vsyncpa [#allocation3], 1 }
 0x102   :  { %511 = vsyncpa [#allocation3 + $0x1], 1 }
 0x103   :  { %512 = vsyncpa [#allocation6], 1 }
 0x104   :  { %514 = vsyncpa [#allocation6 + $0x1], 1 }
 0x105   :  { %515 = vsyncpa [#allocation9], 1 }
 0x106   :  { %516 = vsyncpa [#allocation4], 1 }
 0x107   :  { %518 = vsyncpa [#allocation4 + $0x1], 1 }
 0x108   :  { %519 = vsyncpa [#allocation12], 1 }
 0x109   :  { %521 = vsyncpa [#allocation12 + $0x1], 1 }

// kernel: tpu_custom_call.1
= control target key start
LH: loop header
LB: loop body
LE: loop exit
PB: predicated region body
PF: predicated region fallthrough
CT: control target
= control target key end

     0   :  { %s1225_s0 = inlined_call_operand.hbm [shape: f32[2,8,32], index: 0, kind: input, shape index: {}]   ;;  %s1226_s1 = inlined_call_operand.hbm [shape: f32[2,8,32], index: 1, kind: input, shape index: {}]   ;;  %s1227_s2 = inlined_call_operand.hbm [shape: f32[32,32], index: 2, kind: input, shape index: {}]   ;;  %s1228_s3 = inlined_call_operand.vmem [shape: f32[1,32], index: 3, kind: input, shape index: {}]   ;;  %s1229_s4 = inlined_call_operand.hbm [shape: f32[32,32], index: 4, kind: input, shape index: {}]   ;;  %s1230_s5 = inlined_call_operand.vmem [shape: f32[1,32], index: 5, kind: input, shape index: {}]   ;;  %s1231_s6 = inlined_call_operand.hbm [shape: f32[2,8,32], index: 6, kind: output, shape index: {0}]   ;;  %s1232_s7 = inlined_call_operand.hbm [shape: f32[2,8,32], index: 7, kind: output, shape index: {1}]  }
   0x1   :  { %1237 = sst [smem:[#allocation23_spill]] %s1227_s2 }
   0x2   :  { %1238 = sst [smem:[#allocation24_spill]] %s1229_s4 }
   0x3   :  { %13 = vsyncpa [#allocation3], 0 }
   0x4   :  { %15 = vsyncpa [#allocation3 + $0x1], 0 }
   0x5   :  { %16 = vsyncpa [#allocation6], 0 }
   0x6   :  { %18 = vsyncpa [#allocation6 + $0x1], 0 }
   0x7   :  { %19 = vsyncpa [#allocation9], 0 }
   0x8   :  { %20 = vsyncpa [#allocation4], 0 }
   0x9   :  { %22 = vsyncpa [#allocation4 + $0x1], 0 }
   0xa   :  { %23 = vsyncpa [#allocation12], 0 }
   0xb   :  { %25 = vsyncpa [#allocation12 + $0x1], 0  ;;  %s1007_s24 = smov 0   ;;  %s1009_s25 = smov 0  }
   0xc   :  { %s1011_s26 = smov 0   ;;  %s1013_s27 = smov 0  }
   0xd LB: > { %1239 = sst [smem:[#allocation19_spill]] %s957_s26  ;;  %s1031_s8 = sadd.s32 4294967295, %s961_s27   ;;  %s961_s27 = sphi %s1013_s27, %s1253_s27   ;;  %s957_s26 = sphi %s1011_s26, %s1255_s26   ;;  %s953_s25 = sphi %s1009_s25, %s1257_s25   ;;  %s949_s24 = sphi %s1007_s24, %s1256_s24  }
   0xe   : > { %1240 = sst [smem:[#allocation20_spill]] %s961_s27  ;;  %p627_p0 = scmp.ge.s32.totalorder %s961_s27, 1 }
   0xf   : > { %s1241_s2 = sld [smem:[#allocation23_spill]]  ;;  %p52_p1 = scmp.eq.s32.totalorder %s1031_s8, 0 }
  0x10   : > { %p224_p2 = scmp.lt.s32.totalorder %s961_s27, 3  ;;  %s963_s10 = smov [#allocation7]  }
  0x11   : > { %s237_s11 = sshll.u32 %s963_s10, 4  ;;  %s1243_s4 = sld [smem:[#allocation24_spill]]  ;;  %s238_s11 = int_to_ptr.vmem [resolvable:$true] %s237_s11 }
  0x12   : > { %p1036_p3 = pnand %p627_p0, %p224_p2  ;;  %s964_s15 = smov [#allocation8]  }
  0x13   : > { %s254_s16 = sshll.u32 %s964_s15, 4  ;;  %s965_s17 = smov 128   ;;  %s255_s16 = int_to_ptr.vmem [resolvable:$true] %s254_s16 }
  0x14   : > { %p666_p4 = pneg %p1036_p3  ;;  %s966_s18 = smov 8  }
  0x15   : > { %s235_s30 = sshll.u32 %s1241_s2, 4  ;;  %s626_s19 = sadd.s32 4294967294, %s961_s27   ;;  %s236_s30 = int_to_ptr.hbm [resolvable:$true] %s235_s30 }
  0x16   : > { %p667_p6 = pnand %p666_p4, %p52_p1  ;;  %s1050_s20 = sadd.s32 1, %s961_s27  }
  0x17   : > { %s252_s14 = sshll.u32 %s1243_s4, 4  ;;  %1244 = sst [smem:[#allocation21_spill]] %s1050_s20  ;;  %s253_s14 = int_to_ptr.hbm [resolvable:$true] %s252_s14 }
  0x18   : > { %669 = dma.hbm_to_vmem [thread:$0]  (!%p667_p6), %s236_s30, 512, %s238_s11, [#allocation6], %s965_s17, %s965_s17, %s966_s18  }
  0x19   : > { %672 = dma.hbm_to_vmem [thread:$0]  (!%p667_p6), %s253_s14, 512, %s255_s16, [#allocation9], %s965_s17, %s965_s17, %s966_s18  }
  0x1a   : > { %s35_s21 = ssub.s32 %s961_s27, %s1050_s20  ;;  %s38_s22 = sadd.s32 1, %s957_s26 }
  0x1b   : > { %p36_p7 = scmp.eq.s32.totalorder %s35_s21, 0  ;;  %p45_p8 = scmp.ne.s32.totalorder %s957_s26, %s953_s25 }
  0x1c   : > { %p46_p9 = scmp.eq.s32.totalorder %s961_s27, 0  ;;  %p51_p10 = scmp.ne.s32.totalorder %s953_s25, %s949_s24 }
  0x1d   : > { %s1061_s23 = scalar_select %p36_p7, %s957_s26, %s38_s22  }
  0x1e   : > { %p1063_p11 = por %p46_p9, %p45_p8  ;;  %p1069_p12 = por %p52_p1, %p51_p10 }
  0x1f   : > { %1245 = sst [smem:[#allocation22_spill]] %s1061_s23  ;;  %p185_p13 = scmp.eq.s32.totalorder %s1031_s8, 1 }
  0x20   : > { %p191_p0 = scmp.eq.s32.totalorder %s626_s19, 1  ;;  %p689_p2 = scmp.lt.s32.totalorder %s961_s27, 2 }
  0x21   : > { %s271_s30 = sand.u32 1, %s957_s26   ;;  %p1076_p4 = por %p185_p13, %p45_p8 }
  0x22   : > { %p1080_p6 = por %p191_p0, %p51_p10  ;;  %s1084_s12 = sshll.u32 %s271_s30, 3 }
  0x23   : > { %s632_s13 = sshll.u32 %s961_s27, 3  ;;  %s275_s17 = scalar_lea.vmem [#allocation2], %s1084_s12 }
  0x24   : > { %s279_s16 = scalar_lea.hbm %s1225_s0, %s632_s13  ;;  %s283_s18 = sshll.u32 %s275_s17, 4  ;;  %s284_s18 = int_to_ptr.vmem [resolvable:$true] %s283_s18 }
  0x25   : > { %s281_s19 = sshll.u32 %s279_s16, 4  ;;  %p1093_p7 = pnand %p689_p2, %p1063_p11  ;;  %s282_s19 = int_to_ptr.hbm [resolvable:$true] %s281_s19 }
  0x26   : > { %s298_s4 = scalar_lea.hbm %s1226_s1, %s632_s13  ;;  %s290_s23 = sand.u32 1, %s961_s27  }
  0x27   : > { %s272_s26 = scalar_lea.sflag [#allocation3], %s271_s30  ;;  %s791_s14 = sshra.s32 %s282_s19, 4  ;;  %s792_s14 = int_to_ptr.hbm [resolvable:$true] %s791_s14 }
  0x28   : > { %s793_s15 = scalar_lea.hbm %s792_s14, 8  ;;  %p795_p9 = pneg %p1093_p7 }
  0x29   : > { %p794_p8 = scmp.ne.s32.totalorder %s792_s14, %s793_s15  ;;  %s798_s17 = scalar_lea.hbm %s1225_s0, 16 }
  0x2a   : > { %p799_p13 = scmp.lt.s32.totalorder %s792_s14, %s1225_s0  ;;  %p800_p0 = scmp.lt.s32.totalorder %s798_s17, %s793_s15 }
  0x2b   : > { %p796_p10 = pnand %p795_p9, %p794_p8 }
  0x2c   : > { %p801_p2 = por %p800_p0, %p799_p13 }
  0x2d   : > { %p797_p11 = pneg %p796_p10 }
  0x2f   : > { %p802_p5 = pnand %p801_p2, %p797_p11 }
  0x31   : > { %805 = shalt.err (!%p802_p5)
}
  0x32   : > { %676 = dma.hbm_to_vmem [thread:$0]  (!%p1093_p7), %s282_s19, 128, %s284_s18, %s272_s26  }
  0x33   : > { %s300_s30 = sshll.u32 %s298_s4, 4  ;;  %s294_s13 = scalar_lea.vmem [#allocation5], %s1084_s12  ;;  %s301_s30 = int_to_ptr.hbm [resolvable:$true] %s300_s30 }
  0x34   : > { %s302_s20 = sshll.u32 %s294_s13, 4  ;;  %s291_s28 = scalar_lea.sflag [#allocation6], %s290_s23  ;;  %s303_s20 = int_to_ptr.vmem [resolvable:$true] %s302_s20 }
  0x35   : > { %s821_s16 = sshra.s32 %s301_s30, 4  ;;  %s828_s17 = scalar_lea.hbm %s1226_s1, 16  ;;  %s822_s16 = int_to_ptr.hbm [resolvable:$true] %s821_s16 }
  0x36   : > { %s823_s27 = scalar_lea.hbm %s822_s16, 8  ;;  %p829_p5 = scmp.lt.s32.totalorder %s822_s16, %s1226_s1 }
  0x37   : > { %p824_p8 = scmp.ne.s32.totalorder %s822_s16, %s823_s27  ;;  %p830_p13 = scmp.lt.s32.totalorder %s828_s17, %s823_s27 }
  0x39   : > { %p826_p10 = pnand %p824_p8, %p795_p9  ;;  %p831_p0 = por %p830_p13, %p829_p5 }
  0x3b   : > { %p827_p11 = pneg %p826_p10 }
  0x3d   : > { %p832_p2 = pnand %p831_p0, %p827_p11 }
  0x3f   : > { %835 = shalt.err (!%p832_p2)
}
  0x40   : > { %679 = dma.hbm_to_vmem [thread:$0]  (!%p1093_p7), %s301_s30, 128, %s303_s20, %s291_s28  }
  0x41   : > { %311 = sbr.rel (%p1036_p3) target bundleno = 229 (0xe5), region = 44  ;;  %s1129_s4 = sand.u32 (!%p1036_p3), 1, %s953_s25  }
  0x42   : > { %s1132_s23 = sshll.u32 (!%p1036_p3), %s1129_s4, 3  ;;  %s314_s12 = scalar_lea.sflag (!%p1036_p3), [#allocation3], %s1129_s4 }
  0x43   : > { %s317_s27 = scalar_lea.vmem (!%p1036_p3), [#allocation2], %s1132_s23 }
  0x46   : > { %924 = dma.done.wait (%p1069_p12), %s314_s12, 128  }
  0x47   : > { %926 = vsyncadd (%p1069_p12), %s314_s12, 4294967168  ;;  %s323_s9 = sand.u32 1, %s1031_s8   ;;  %s327_s18 = scalar_lea.vmem [#allocation5], %s1132_s23 }
  0x48   : > { %s324_s20 = scalar_lea.sflag [#allocation6], %s323_s9 }
  0x49   : > { %928 = dma.done.wait (%p1069_p12), %s324_s20, 128  }
  0x4a   : > { %930 = vsyncadd (%p1069_p12), %s324_s20, 4294967168 }
  0x4b   : > { %932 = dma.done.wait (%p52_p1), [#allocation6], 512  }
  0x4c   : > { %934 = vsyncadd (%p52_p1), [#allocation6], 4294966784 }
  0x4d   : > { %936 = dma.done.wait (%p52_p1), [#allocation9], 512  }
  0x4e   : > { %938 = vsyncadd (%p52_p1), [#allocation9], 4294966784  ;;  %v384_v0 = vld [vmem:[#allocation7 + $0x18] sm:$0xff]  ;;  %v383_v2 = vld [vmem:[#allocation7 + $0x10] sm:$0xff]  ;;  %vm389_vm0 = vcmask 261120   ;;  %s646_s29 = sshll.u32 %s1031_s8, 3 }
  0x4f   : > { %v416_v1 = vld [vmem:[#allocation8 + $0x18] sm:$0xff]  ;;  %405 = vmatpush.msra.mxu0 %v384_v0  ;;  %v415_v3 = vld [vmem:[#allocation8 + $0x10] sm:$0xff]  ;;  %v382_v4 = vld [vmem:[#allocation7 + $0x8] sm:$0xff]  ;;  %s462_s22 = scalar_lea.hbm %s1231_s6, %s646_s29  ;;  %s476_s28 = scalar_lea.hbm %s1232_s7, %s646_s29 }
  0x50   : > { %436 = vmatpush.msra.mxu1 %v416_v1  ;;  %v414_v5 = vld [vmem:[#allocation8 + $0x8] sm:$0xff]  ;;  %v381_v6 = vld [vmem:[#allocation7] sm:$0xff]  ;;  %v380_v9 = vld [vmem:[%s327_s18] sm:$0xff]  ;;  %s371_s2 = scalar_lea.vmem [#allocation10], %s1132_s23  ;;  %s466_s8 = sshll.u32 %s462_s22, 4  ;;  %s467_s8 = int_to_ptr.hbm [resolvable:$true] %s466_s8 }
  0x51   : > { %406 = vmatpush.msra.mxu0 %v383_v2  ;;  %v413_v7 = vld [vmem:[#allocation8] sm:$0xff]  ;;  %s1170_s26 = sshll.u32 %s371_s2, 4  ;;  %s378_s12 = scalar_lea.vmem [#allocation11], %s1132_s23  ;;  %s465_s26 = int_to_ptr.vmem [resolvable:$true] %s1170_s26 }
  0x52   : > { %437 = vmatpush.msra.mxu1 %v415_v3  ;;  %v379_v8 = vld [vmem:[%s317_s27] sm:$0xff]  ;;  %s1173_s27 = sshll.u32 %s378_s12, 4  ;;  %s480_s9 = sshll.u32 %s476_s28, 4  ;;  %s479_s27 = int_to_ptr.vmem [resolvable:$true] %s1173_s27  ;;  %s1177_s9 = int_to_ptr.hbm [resolvable:$true] %s480_s9 }
  0x53   : > { %407 = vmatpush.msra.mxu0 %v382_v4  ;;  %v729_v10 = vld [vmem:[%s1228_s3] ss:$0 sm:$0xff]  ;;  %s447_s20 = scalar_lea.sflag [#allocation4], %s1129_s4  ;;  %s865_s18 = sshra.s32 %s467_s8, 4  ;;  %s866_s18 = int_to_ptr.hbm [resolvable:$true] %s865_s18 }
  0x54   : > { %438 = vmatpush.msra.mxu1 %v414_v5  ;;  %v730_v11 = vld [vmem:[%s1230_s5] ss:$0 sm:$0xff]  ;;  %s867_s23 = scalar_lea.hbm %s866_s18, 8  ;;  %s871_s21 = scalar_lea.hbm %s1231_s6, 16 }
  0x55   : > { %408 = vmatpush.msra.mxu0 %v381_v6  ;;  %p868_p1 = scmp.ne.s32.totalorder %s866_s18, %s867_s23  ;;  %p872_p7 = scmp.lt.s32.totalorder %s866_s18, %s1231_s6 }
  0x56   : > { %439 = vmatpush.msra.mxu1 %v413_v7  ;;  %642 = vmatmul.msk.f32.vlgmr.msra.gmra.mxu0 %vm389_vm0, %v379_v8  ;;  %p873_p9 = scmp.lt.s32.totalorder %s871_s21, %s867_s23 }
  0x57   : > { %643 = vmatmul.msk.f32.vlgmr.msra.gmra.mxu1 %vm389_vm0, %v380_v9  ;;  %p869_p3 = pnand %p868_p1, %p1076_p4 }
  0x58   : > { %p874_p8 = por %p873_p9, %p872_p7 }
  0x59   : > { %p870_p12 = pneg %p869_p3 }
  0x5b   : > { %p875_p10 = pnand %p874_p8, %p870_p12 }
  0xd3   : > { %v410_v12 = vpop.f32.mrf.mxu0 }
  0xd4   : > { %v441_v13 = vpop.f32.mrf.mxu1  ;;  %v411_v14 = vadd.f32 %v729_v10, %v410_v12 }
  0xd5   : > { %v442_v15 = vadd.f32 %v730_v11, %v441_v13 }
  0xd6   : > { %444 = vst.msk [vmem:[%s371_s2] sm:$0xff] %vm389_vm0, %v411_v14 }
  0xd7   : > { %878 = shalt.err (!%p875_p10)
}
  0xd8   : > { %662 = dma.vmem_to_hbm [thread:$0]  (%p1076_p4), %s465_s26, 128, %s467_s8, %s447_s20   ;;  %445 = vst.msk [vmem:[%s378_s12] sm:$0xff] %vm389_vm0, %v442_v15 }
  0xd9   : > { %s452_s13 = scalar_lea.sflag [#allocation12], %s1129_s4  ;;  %s893_s28 = sshra.s32 %s1177_s9, 4  ;;  %s894_s28 = int_to_ptr.hbm [resolvable:$true] %s893_s28 }
  0xda   : > { %s895_s16 = scalar_lea.hbm %s894_s28, 8  ;;  %s899_s17 = scalar_lea.hbm %s1232_s7, 16 }
  0xdb   : > { %p896_p11 = scmp.ne.s32.totalorder %s894_s28, %s895_s16  ;;  %p900_p0 = scmp.lt.s32.totalorder %s894_s28, %s1232_s7 }
  0xdc   : > { %p901_p2 = scmp.lt.s32.totalorder %s899_s17, %s895_s16 }
  0xdd   : > { %p897_p5 = pnand %p896_p11, %p1076_p4 }
  0xde   : > { %p902_p1 = por %p901_p2, %p900_p0 }
  0xdf   : > { %p898_p13 = pneg %p897_p5 }
  0xe1   : > { %p903_p3 = pnand %p902_p1, %p898_p13 }
  0xe3   : > { %906 = shalt.err (!%p903_p3)
}
  0xe4   : > { %663 = dma.vmem_to_hbm [thread:$0]  (%p1076_p4), %s479_s27, 128, %s1177_s9, %s452_s13  }
  0xe5 PF: > { %s1251_s4 = sld [smem:[#allocation20_spill]]  ;;  %s492_s26 = sand.u32 1, %s949_s24  }
  0xe6   : > { %s493_s8 = scalar_lea.sflag [#allocation4], %s492_s26 }
  0xeb   : > { %p1252_p12 = scmp.ge.s32.totalorder %s1251_s4, 2 }
  0xed   : > { %p681_p7 = pnand %p1252_p12, %p1080_p6 }
  0xef   : > { %p682_p9 = pneg %p681_p7 }
  0xf1   : > { %940 = dma.done.wait (%p682_p9), %s493_s8, 128  }
  0xf2   : > { %942 = vsyncadd (%p682_p9), %s493_s8, 4294967168  ;;  %s503_s12 = scalar_lea.sflag [#allocation12], %s492_s26 }
  0xf3   : > { %944 = dma.done.wait (%p682_p9), %s503_s12, 128  }
  0xf4   : > { %946 = vsyncadd (%p682_p9), %s503_s12, 4294967168  ;;  %s1253_s27 = sld [smem:[#allocation21_spill]]  ;;  %s1256_s24 = smov %s953_s25 }
  0xf5   : > { %s1254_s10 = sld [smem:[#allocation19_spill]] }
  0xf6   : > { %s1255_s26 = sld [smem:[#allocation22_spill]] }
  0xfa   : > { %p28_p4 = scmp.ge.s32.totalorder %s1253_s27, 4  }
  0xfb   : > { %s1257_s25 = smov %s1254_s10 }
  0xfc   :  { %30 = sbr.rel (!%p28_p4) target bundleno = 13 (0xd), region = 127 }
 0x101   :  { %509 = vsyncpa [#allocation3], 1 }
 0x102   :  { %511 = vsyncpa [#allocation3 + $0x1], 1 }
 0x103   :  { %512 = vsyncpa [#allocation6], 1 }
 0x104   :  { %514 = vsyncpa [#allocation6 + $0x1], 1 }
 0x105   :  { %515 = vsyncpa [#allocation9], 1 }
 0x106   :  { %516 = vsyncpa [#allocation4], 1 }
 0x107   :  { %518 = vsyncpa [#allocation4 + $0x1], 1 }
 0x108   :  { %519 = vsyncpa [#allocation12], 1 }
 0x109   :  { %521 = vsyncpa [#allocation12 + $0x1], 1 }

</bundles_post_ra>
